<compile_context>
chip_gen: v7x
topology: tpu7x:2x2x1
jax: 0.10.0
libtpu: 0.0.40
codegen_flags: <defaults>
</compile_context>

<pallas_src>
import functools

import jax
import jax.numpy as jnp
from jax.experimental import pallas as pl
from jax.experimental.pallas import tpu as pltpu


def _self_attention_kernel(x_ref, len_ref, wqkv_ref, wf_ref, params_ref,
                           out_ref, *maybe_qk_ref, dim):
    """One grid step: a block of BB sequences, flattened to (BB*T, DP) rows."""
    BB, T, DP = x_ref.shape
    R = BB * T
    inv_dim = 1.0 / float(dim)          # real (un-padded) feature width
    scale = float(dim) ** -0.5

    # ---- padding masks straight from the VMEM-blocked lengths ---------------
    lens = len_ref[...]                                    # (BB, 1, 1) int32
    t_row = jax.lax.broadcasted_iota(jnp.int32, (BB, T, 1), 1)
    t_col = jax.lax.broadcasted_iota(jnp.int32, (BB, 1, T), 2)
    row_valid = t_row < lens                               # (BB, T, 1) valid query rows
    key_valid = t_col < lens                               # (BB, 1, T) valid key cols

    # ---- zero padded timesteps of the input (inputs.masked_fill_) -----------
    x3 = jnp.where(row_valid, x_ref[...], 0.0)             # (BB, T, DP) f32
    x = x3.reshape(R, DP)
    x_bf = x.astype(jnp.bfloat16)

    # ---- fused q/k/v projection (slices are 128-lane aligned: DP % 128 == 0)
    qkv = jnp.dot(x_bf, wqkv_ref[...], preferred_element_type=jnp.float32)
    q = qkv[:, 0 * DP:1 * DP].reshape(BB, T, DP).astype(jnp.bfloat16)
    k = qkv[:, 1 * DP:2 * DP].reshape(BB, T, DP).astype(jnp.bfloat16)
    v = qkv[:, 2 * DP:3 * DP].reshape(BB, T, DP).astype(jnp.bfloat16)

    # ---- scaled dot-product attention (contract last axes; no k transpose) --
    scores = jnp.einsum("bqd,bkd->bqk", q, k,
                        preferred_element_type=jnp.float32) * scale
    scores = jnp.where(key_valid, scores, -jnp.inf)
    m = jnp.max(scores, axis=-1, keepdims=True)
    e = jnp.exp(scores - m)
    s = jnp.sum(e, axis=-1, keepdims=True)
    attn_bf = (e * pl.reciprocal(s, approx=True)).astype(jnp.bfloat16)
    if maybe_qk_ref:                        # static: attention writeback optional
        maybe_qk_ref[0][...] = attn_bf

    # ---- context + ReLU ------------------------------------------------------
    ctx = jnp.einsum("bqk,bkd->bqd", attn_bf, v,
                     preferred_element_type=jnp.float32)
    ctx = jnp.maximum(ctx, 0.0).reshape(R, DP)

    # ---- fused (5, DP) parameter block: bf | ln1w | ln1b | ln2w | ln2b -------
    p = params_ref[...]
    b_f = p[0:1, :]
    ln1w = p[1:2, :]
    ln1b = p[2:3, :]
    ln2w = p[3:4, :]
    ln2b = p[4:5, :]

    # ---- residual 1 + LayerNorm1 (one-pass sums, real-D divisor) -------------
    mid = ctx + x
    mu1 = jnp.sum(mid, axis=-1, keepdims=True) * inv_dim
    ms1 = jnp.sum(mid * mid, axis=-1, keepdims=True) * inv_dim
    mid_n = (mid - mu1) * jax.lax.rsqrt(ms1 - mu1 * mu1 + 1e-5) * ln1w + ln1b

    # ---- feed-forward + ReLU + residual 2 + LayerNorm2 ------------------------
    ff = jnp.dot(mid_n.astype(jnp.bfloat16), wf_ref[...],
                 preferred_element_type=jnp.float32)
    ff = jnp.maximum(ff + b_f, 0.0)
    out = ff + mid_n
    mu2 = jnp.sum(out, axis=-1, keepdims=True) * inv_dim
    ms2 = jnp.sum(out * out, axis=-1, keepdims=True) * inv_dim
    out_n = (out - mu2) * jax.lax.rsqrt(ms2 - mu2 * mu2 + 1e-5) * ln2w + ln2b

    # ---- zero padded output rows; lane-dense (DP-wide) store ------------------
    out_n = jnp.where(row_valid.reshape(R, 1), out_n, 0.0)
    out_ref[...] = out_n.reshape(BB, T, DP).astype(out_ref.dtype)


def _two_tensorcores_per_chip():
    """True on chips whose grid is sharded across 2 TensorCores (v7x-class)."""
    try:
        kind = jax.devices()[0].device_kind.lower()
    except Exception:
        return False
    return any(tag in kind for tag in ("7", "v4", "v5p"))


def _pick_block_b(B, T, DP, prefer_even_grid, target_rows=512,
                  vmem_budget=40 << 20):
    """Batch block: >= target_rows flattened rows per step when possible; on
    dual-TC chips keep the grid even; cap bb by a rough per-step VMEM cost."""
    # per-sequence footprint: double-buffered x/out/attn blocks + f32 temps.
    per_seq = (2 * 2 * (T * DP * 4) + 2 * (T * T * 2)
               + 4 * T * T * 4 + 7 * T * DP * 4)
    max_bb = max(1, vmem_budget // max(per_seq, 1))
    divisors = [d for d in range(1, B + 1) if B % d == 0 and d <= max_bb]
    if not divisors:
        divisors = [1]
    cands = divisors
    if prefer_even_grid:
        even = [d for d in divisors if (B // d) % 2 == 0]
        if even:
            cands = even
    for bb in cands:
        if bb * T >= target_rows:
            return bb
    return cands[-1]


def _pad_last(a, dp):
    pad = dp - a.shape[-1]
    if pad == 0:
        return a
    return jnp.pad(a, [(0, 0)] * (a.ndim - 1) + [(0, pad)])


def _pad_weight(w, dp):
    return jnp.pad(w, ((0, dp - w.shape[0]), (0, dp - w.shape[1])))


@functools.partial(jax.jit, static_argnames=("block_b", "return_attention"))
def self_attention_forward(x, lengths, wq_t, wk_t, wv_t, wf_t, bf,
                           ln1w, ln1b, ln2w, ln2b, *,
                           block_b=None, return_attention=True):
    """x: (B, T, D) f32; lengths: (B,) int32; Linear weights pre-transposed as
    (in, out). Returns (out (B,T,D) f32, attn (B,1,T,T) bf16) or just out."""
    B, T, D = x.shape
    DP = ((D + 127) // 128) * 128            # lane-dense padded feature width
    two_tc = _two_tensorcores_per_chip()
    bb = block_b if block_b is not None else _pick_block_b(B, T, DP, two_tc)
    if B % bb != 0:
        raise ValueError(f"block_b={bb} must divide batch size B={B}")
    nb = B // bb

    # Zero-pad feature dims to DP; padded lanes carry exact zeros end-to-end
    # (padded weight cols/rows, bias and LN params are zero).
    x_p = _pad_last(x, DP)
    wqkv = jnp.concatenate(
        [_pad_weight(wq_t, DP), _pad_weight(wk_t, DP), _pad_weight(wv_t, DP)],
        axis=1).astype(jnp.bfloat16)                           # (DP, 3*DP)
    wf_p = _pad_weight(wf_t, DP).astype(jnp.bfloat16)          # (DP, DP)
    params = jnp.concatenate(
        [_pad_last(bf, DP), _pad_last(ln1w, DP), _pad_last(ln1b, DP),
         _pad_last(ln2w, DP), _pad_last(ln2b, DP)],
        axis=0).astype(jnp.float32)                            # (5, DP)
    lens3 = lengths.astype(jnp.int32).reshape(B, 1, 1)

    full = lambda b: (0, 0)
    in_specs = [
        pl.BlockSpec((bb, T, DP), lambda b: (b, 0, 0)),        # x
        pl.BlockSpec((bb, 1, 1), lambda b: (b, 0, 0)),         # lengths
        pl.BlockSpec((DP, 3 * DP), full),                      # fused Wqkv
        pl.BlockSpec((DP, DP), full),                          # Wf
        pl.BlockSpec((5, DP), full),                           # bf|ln1w|ln1b|ln2w|ln2b
    ]
    out_shapes = [jax.ShapeDtypeStruct((B, T, DP), jnp.float32)]
    out_specs = [pl.BlockSpec((bb, T, DP), lambda b: (b, 0, 0))]
    if return_attention:
        out_shapes.append(jax.ShapeDtypeStruct((B, T, T), jnp.bfloat16))
        out_specs.append(pl.BlockSpec((bb, T, T), lambda b: (b, 0, 0)))

    # VMEM budget: double-buffered blocks + weights + in-step f32 intermediates.
    need = (2 * (2 * bb * T * DP * 4
                 + (bb * T * T * 2 if return_attention else 0))
            + 2 * (3 * DP * DP * 2 + DP * DP * 2 + 5 * DP * 4)
            + bb * T * 3 * DP * 4 + 4 * bb * T * T * 4 + 6 * bb * T * DP * 4)
    vmem_limit = int(min(max(need + (8 << 20), 32 << 20), 60 << 20))

    flops = 2 * B * T * (4 * DP * DP) + 4 * B * T * T * DP
    bytes_accessed = (B * T * DP * 8
                      + (2 * B * T * T if return_attention else 0)
                      + 2 * (3 * DP * DP + DP * DP) + 4 * 5 * DP + 4 * B)
    cost = pl.CostEstimate(flops=flops, transcendentals=B * T * T,
                           bytes_accessed=bytes_accessed)

    kernel = functools.partial(_self_attention_kernel, dim=D)
    res = pl.pallas_call(
        kernel,
        out_shape=tuple(out_shapes),
        grid_spec=pltpu.PrefetchScalarGridSpec(
            num_scalar_prefetch=0,
            grid=(nb,),
            in_specs=in_specs,
            out_specs=out_specs,
        ),
        compiler_params=pltpu.CompilerParams(
            dimension_semantics=("parallel",),
            vmem_limit_bytes=vmem_limit),
        cost_estimate=cost,
    )(x_p, lens3, wqkv, wf_p, params)

    out = res[0][:, :, :D]                  # strip feature padding
    if return_attention:
        # attention_head == 1: expose the (B, H, T, T) layout of the module.
        return out, res[1].reshape(B, 1, T, T)
    return out


def _reference(x, lengths, wq_t, wk_t, wv_t, wf_t, bf, ln1w, ln1b, ln2w, ln2b):
    """Pure-JAX f32 mirror of the PyTorch forward, for correctness checking."""
    B, T, D = x.shape
    pos = jnp.arange(T)
    valid = pos[None, :] < lengths[:, None]                 # (B, T)
    x = jnp.where(valid[..., None], x, 0.0)
    q = x @ wq_t
    k = x @ wk_t
    v = x @ wv_t
    scores = jnp.einsum("btd,bsd->bts", q, k) / (D ** 0.5)
    scores = jnp.where(valid[:, None, :], scores, -jnp.inf)
    attn = jax.nn.softmax(scores, axis=-1)
    ctx = jnp.maximum(jnp.einsum("bts,bsd->btd", attn, v), 0.0)
    mid = ctx + x

    def ln(z, w, b):
        mu = z.mean(-1, keepdims=True)
        var = ((z - mu) ** 2).mean(-1, keepdims=True)
        return (z - mu) * jax.lax.rsqrt(var + 1e-5) * w + b

    mid_n = ln(mid, ln1w[0], ln1b[0])
    ff = jnp.maximum(mid_n @ wf_t + bf[0], 0.0)
    out = ln(ff + mid_n, ln2w[0], ln2b[0])
    out = jnp.where(valid[..., None], out, 0.0)
    return out, attn[:, None, :, :]


if __name__ == "__main__":
    B, T, D = 4, 8, 32      # input_size == hidden_size == D (required by LN dims)

    key = jax.random.PRNGKey(0)
    kx, kq, kk, kv, kf, kb = jax.random.split(key, 6)

    x = jax.random.normal(kx, (B, T, D), dtype=jnp.float32)
    lengths = jnp.array([T, 5, 8, 3], dtype=jnp.int32)   # keep > 0 (len==0 => NaN row, as in PyTorch)

    # Linear weights (PyTorch stores (out, in); we pass W^T = (in, out)).
    wq_t = 0.1 * jax.random.normal(kq, (D, D), dtype=jnp.float32)
    wk_t = 0.1 * jax.random.normal(kk, (D, D), dtype=jnp.float32)
    wv_t = 0.1 * jax.random.normal(kv, (D, D), dtype=jnp.float32)
    wf_t = 0.1 * jax.random.normal(kf, (D, D), dtype=jnp.float32)
    bf = 0.1 * jax.random.normal(kb, (1, D), dtype=jnp.float32)
    # LayerNorm params (PyTorch default init: weight=1, bias=0).
    ln1w = jnp.ones((1, D), dtype=jnp.float32)
    ln1b = jnp.zeros((1, D), dtype=jnp.float32)
    ln2w = jnp.ones((1, D), dtype=jnp.float32)
    ln2b = jnp.zeros((1, D), dtype=jnp.float32)

    out, attn = self_attention_forward(
        x, lengths, wq_t, wk_t, wv_t, wf_t, bf, ln1w, ln1b, ln2w, ln2b)
    jax.block_until_ready((out, attn))

    # attention-free fast path (skips the (B,T,T) HBM writeback).
    out_no_attn = self_attention_forward(
        x, lengths, wq_t, wk_t, wv_t, wf_t, bf, ln1w, ln1b, ln2w, ln2b,
        return_attention=False)
    jax.block_until_ready(out_no_attn)

    ref_out, ref_attn = _reference(
        x, lengths, wq_t, wk_t, wv_t, wf_t, bf, ln1w, ln1b, ln2w, ln2b)

    # bf16 MXU operands + bf16 attention writeback -> tolerances looser than f32.
    assert jnp.allclose(out, ref_out, atol=3e-2, rtol=3e-2), "output mismatch"
    assert jnp.allclose(out_no_attn, out, atol=1e-5, rtol=1e-5), "flag mismatch"
    assert jnp.allclose(attn.astype(jnp.float32), ref_attn,
                        atol=2e-2, rtol=2e-2), "attention mismatch"

    print("KERNEL_OK")
</pallas_src>

<mosaic_0001>
module attributes {stable_mosaic.version = 11 : i64} {
  func.func @_self_attention_kernel(%arg0: i32, %arg1: memref<4x8x128xf32, #tpu.memory_space<vmem>>, %arg2: memref<4x1x1xi32, #tpu.memory_space<vmem>>, %arg3: memref<128x384xbf16, #tpu.memory_space<vmem>>, %arg4: memref<128x128xbf16, #tpu.memory_space<vmem>>, %arg5: memref<5x128xf32, #tpu.memory_space<vmem>>, %arg6: memref<4x8x128xf32, #tpu.memory_space<vmem>>, %arg7: memref<4x8x8xbf16, #tpu.memory_space<vmem>>) attributes {dimension_semantics = [#tpu.dimension_semantics<parallel>], iteration_bounds = array<i64: 1>, scalar_prefetch = 0 : i64, scratch_operands = 0 : i64, tpu.core_type = #tpu.core_type<tc>, window_params = [{transform_indices = @transform_0, window_bounds = array<i64: 4, 8, 128>}, {transform_indices = @transform_1, window_bounds = array<i64: 4, 1, 1>}, {pipeline_mode = #tpu.pipeline_mode<synchronous>, transform_indices = @transform_2, window_bounds = array<i64: 128, 384>}, {pipeline_mode = #tpu.pipeline_mode<synchronous>, transform_indices = @transform_3, window_bounds = array<i64: 128, 128>}, {pipeline_mode = #tpu.pipeline_mode<synchronous>, transform_indices = @transform_4, window_bounds = array<i64: 5, 128>}, {transform_indices = @transform_5, window_bounds = array<i64: 4, 8, 128>}, {transform_indices = @transform_6, window_bounds = array<i64: 4, 8, 8>}]} {
    %c0 = arith.constant 0 : index
    %c0_0 = arith.constant 0 : index
    %c0_1 = arith.constant 0 : index
    %0 = vector.load %arg2[%c0, %c0_0, %c0_1] : memref<4x1x1xi32, #tpu.memory_space<vmem>>, vector<4x1x1xi32>
    %1 = tpu.iota {dimensions = array<i32: 1>} : vector<4x8x1xi32>
    %2 = tpu.iota {dimensions = array<i32: 2>} : vector<4x1x8xi32>
    %3 = vector.broadcast %0 : vector<4x1x1xi32> to vector<4x8x1xi32>
    %4 = arith.cmpi slt, %1, %3 : vector<4x8x1xi32>
    %5 = vector.broadcast %0 : vector<4x1x1xi32> to vector<4x1x8xi32>
    %6 = arith.cmpi slt, %2, %5 : vector<4x1x8xi32>
    %c0_2 = arith.constant 0 : index
    %c0_3 = arith.constant 0 : index
    %c0_4 = arith.constant 0 : index
    %7 = vector.load %arg1[%c0_2, %c0_3, %c0_4] : memref<4x8x128xf32, #tpu.memory_space<vmem>>, vector<4x8x128xf32>
    %cst = arith.constant 0.000000e+00 : f32
    %8 = vector.shape_cast %4 : vector<4x8x1xi1> to vector<4x8x1xi1>
    %9 = vector.broadcast %8 : vector<4x8x1xi1> to vector<4x8x128xi1>
    %10 = vector.broadcast %cst : f32 to vector<4x8x128xf32>
    %11 = arith.select %9, %7, %10 : vector<4x8x128xi1>, vector<4x8x128xf32>
    %12 = vector.shape_cast %11 : vector<4x8x128xf32> to vector<32x128xf32>
    %13 = arith.truncf %12 : vector<32x128xf32> to vector<32x128xbf16>
    %c0_5 = arith.constant 0 : index
    %c0_6 = arith.constant 0 : index
    %14 = vector.load %arg3[%c0_5, %c0_6] : memref<128x384xbf16, #tpu.memory_space<vmem>>, vector<128x384xbf16>
    %cst_7 = arith.constant dense<0.000000e+00> : vector<32x384xf32>
    %15 = tpu.matmul %13, %14, %cst_7 {dimension_numbers = #tpu.dot_dimension_numbers<[1], [0], [0], [1], [0, 0, 1, 1], [], []>} : vector<32x128xbf16>, vector<128x384xbf16>, vector<32x384xf32> -> vector<32x384xf32>
    %16 = vector.extract_strided_slice %15 {offsets = [0, 0], sizes = [32, 128], strides = [1, 1]} : vector<32x384xf32> to vector<32x128xf32>
    %17 = vector.shape_cast %16 : vector<32x128xf32> to vector<4x8x128xf32>
    %18 = arith.truncf %17 : vector<4x8x128xf32> to vector<4x8x128xbf16>
    %19 = vector.extract_strided_slice %15 {offsets = [0, 128], sizes = [32, 128], strides = [1, 1]} : vector<32x384xf32> to vector<32x128xf32>
    %20 = vector.shape_cast %19 : vector<32x128xf32> to vector<4x8x128xf32>
    %21 = arith.truncf %20 : vector<4x8x128xf32> to vector<4x8x128xbf16>
    %22 = vector.extract_strided_slice %15 {offsets = [0, 256], sizes = [32, 128], strides = [1, 1]} : vector<32x384xf32> to vector<32x128xf32>
    %23 = vector.shape_cast %22 : vector<32x128xf32> to vector<4x8x128xf32>
    %24 = arith.truncf %23 : vector<4x8x128xf32> to vector<4x8x128xbf16>
    "tpu.trace_start"() <{level = 10 : i32, message = "bqd,bkd->bqk"}> : () -> ()
    %cst_8 = arith.constant dense<0.000000e+00> : vector<4x8x8xf32>
    %25 = tpu.matmul %18, %21, %cst_8 {dimension_numbers = #tpu.dot_dimension_numbers<[2], [2], [1], [1], [0, 0, 0, 1, 1, 1], [0], [0]>} : vector<4x8x128xbf16>, vector<4x8x128xbf16>, vector<4x8x8xf32> -> vector<4x8x8xf32>
    "tpu.trace_stop"() : () -> ()
    %cst_9 = arith.constant 0.176776692 : f32
    %26 = vector.broadcast %cst_9 : f32 to vector<4x8x8xf32>
    %27 = arith.mulf %25, %26 : vector<4x8x8xf32>
    %cst_10 = arith.constant 0xFF800000 : f32
    %28 = vector.shape_cast %6 : vector<4x1x8xi1> to vector<4x1x8xi1>
    %29 = vector.broadcast %28 : vector<4x1x8xi1> to vector<4x8x8xi1>
    %30 = vector.broadcast %cst_10 : f32 to vector<4x8x8xf32>
    %31 = arith.select %29, %27, %30 : vector<4x8x8xi1>, vector<4x8x8xf32>
    %cst_11 = arith.constant dense<0xFF800000> : vector<4x8xf32>
    %32 = vector.multi_reduction <maximumf>, %31, %cst_11 [2] : vector<4x8x8xf32> to vector<4x8xf32>
    %33 = vector.shape_cast %32 : vector<4x8xf32> to vector<4x8x1xf32>
    %34 = vector.broadcast %33 : vector<4x8x1xf32> to vector<4x8x8xf32>
    %35 = arith.subf %31, %34 : vector<4x8x8xf32>
    %36 = math.exp %35 : vector<4x8x8xf32>
    %cst_12 = arith.constant dense<0.000000e+00> : vector<4x8xf32>
    %37 = vector.multi_reduction <add>, %36, %cst_12 [2] : vector<4x8x8xf32> to vector<4x8xf32>
    %38 = vector.shape_cast %37 : vector<4x8xf32> to vector<4x8x1xf32>
    %39 = tpu.reciprocal %38 {approx = true} : vector<4x8x1xf32> -> vector<4x8x1xf32>
    %40 = vector.broadcast %39 : vector<4x8x1xf32> to vector<4x8x8xf32>
    %41 = arith.mulf %36, %40 : vector<4x8x8xf32>
    %42 = arith.truncf %41 : vector<4x8x8xf32> to vector<4x8x8xbf16>
    %c0_13 = arith.constant 0 : index
    %c0_14 = arith.constant 0 : index
    %c0_15 = arith.constant 0 : index
    %43 = vector.load %arg7[%c0_13, %c0_14, %c0_15] : memref<4x8x8xbf16, #tpu.memory_space<vmem>>, vector<4x8x8xbf16>
    tpu.vector_store %arg7[%c0_13, %c0_14, %c0_15], %42 {strides = array<i32>} : memref<4x8x8xbf16, #tpu.memory_space<vmem>>, vector<4x8x8xbf16>,
    "tpu.trace_start"() <{level = 10 : i32, message = "bqk,bkd->bqd"}> : () -> ()
    %cst_16 = arith.constant dense<0.000000e+00> : vector<4x8x128xf32>
    %44 = tpu.matmul %42, %24, %cst_16 {dimension_numbers = #tpu.dot_dimension_numbers<[2], [1], [1], [2], [0, 0, 0, 1, 1, 2], [0], [0]>} : vector<4x8x8xbf16>, vector<4x8x128xbf16>, vector<4x8x128xf32> -> vector<4x8x128xf32>
    "tpu.trace_stop"() : () -> ()
    %cst_17 = arith.constant 0.000000e+00 : f32
    %45 = vector.broadcast %cst_17 : f32 to vector<4x8x128xf32>
    %46 = arith.maximumf %44, %45 : vector<4x8x128xf32>
    %47 = vector.shape_cast %46 : vector<4x8x128xf32> to vector<32x128xf32>
    %c0_18 = arith.constant 0 : index
    %c0_19 = arith.constant 0 : index
    %48 = vector.load %arg5[%c0_18, %c0_19] : memref<5x128xf32, #tpu.memory_space<vmem>>, vector<5x128xf32>
    %49 = vector.extract_strided_slice %48 {offsets = [0, 0], sizes = [1, 128], strides = [1, 1]} : vector<5x128xf32> to vector<1x128xf32>
    %50 = vector.extract_strided_slice %48 {offsets = [1, 0], sizes = [1, 128], strides = [1, 1]} : vector<5x128xf32> to vector<1x128xf32>
    %51 = vector.extract_strided_slice %48 {offsets = [2, 0], sizes = [1, 128], strides = [1, 1]} : vector<5x128xf32> to vector<1x128xf32>
    %52 = vector.extract_strided_slice %48 {offsets = [3, 0], sizes = [1, 128], strides = [1, 1]} : vector<5x128xf32> to vector<1x128xf32>
    %53 = vector.extract_strided_slice %48 {offsets = [4, 0], sizes = [1, 128], strides = [1, 1]} : vector<5x128xf32> to vector<1x128xf32>
    %54 = arith.addf %47, %12 : vector<32x128xf32>
    %cst_20 = arith.constant dense<0.000000e+00> : vector<32xf32>
    %55 = vector.multi_reduction <add>, %54, %cst_20 [1] : vector<32x128xf32> to vector<32xf32>
    %56 = vector.shape_cast %55 : vector<32xf32> to vector<32x1xf32>
    %cst_21 = arith.constant 3.125000e-02 : f32
    %57 = vector.broadcast %cst_21 : f32 to vector<32x1xf32>
    %58 = arith.mulf %56, %57 : vector<32x1xf32>
    %59 = arith.mulf %54, %54 : vector<32x128xf32>
    %cst_22 = arith.constant dense<0.000000e+00> : vector<32xf32>
    %60 = vector.multi_reduction <add>, %59, %cst_22 [1] : vector<32x128xf32> to vector<32xf32>
    %61 = vector.shape_cast %60 : vector<32xf32> to vector<32x1xf32>
    %cst_23 = arith.constant 3.125000e-02 : f32
    %62 = vector.broadcast %cst_23 : f32 to vector<32x1xf32>
    %63 = arith.mulf %61, %62 : vector<32x1xf32>
    %64 = vector.broadcast %58 : vector<32x1xf32> to vector<32x128xf32>
    %65 = arith.subf %54, %64 : vector<32x128xf32>
    %66 = arith.mulf %58, %58 : vector<32x1xf32>
    %67 = arith.subf %63, %66 : vector<32x1xf32>
    %cst_24 = arith.constant 9.99999974E-6 : f32
    %68 = vector.broadcast %cst_24 : f32 to vector<32x1xf32>
    %69 = arith.addf %67, %68 : vector<32x1xf32>
    %70 = math.rsqrt %69 : vector<32x1xf32>
    %71 = vector.broadcast %70 : vector<32x1xf32> to vector<32x128xf32>
    %72 = arith.mulf %65, %71 : vector<32x128xf32>
    %73 = vector.broadcast %50 : vector<1x128xf32> to vector<32x128xf32>
    %74 = arith.mulf %72, %73 : vector<32x128xf32>
    %75 = vector.broadcast %51 : vector<1x128xf32> to vector<32x128xf32>
    %76 = arith.addf %74, %75 : vector<32x128xf32>
    %77 = arith.truncf %76 : vector<32x128xf32> to vector<32x128xbf16>
    %c0_25 = arith.constant 0 : index
    %c0_26 = arith.constant 0 : index
    %78 = vector.load %arg4[%c0_25, %c0_26] : memref<128x128xbf16, #tpu.memory_space<vmem>>, vector<128x128xbf16>
    %cst_27 = arith.constant dense<0.000000e+00> : vector<32x128xf32>
    %79 = tpu.matmul %77, %78, %cst_27 {dimension_numbers = #tpu.dot_dimension_numbers<[1], [0], [0], [1], [0, 0, 1, 1], [], []>} : vector<32x128xbf16>, vector<128x128xbf16>, vector<32x128xf32> -> vector<32x128xf32>
    %80 = vector.broadcast %49 : vector<1x128xf32> to vector<32x128xf32>
    %81 = arith.addf %79, %80 : vector<32x128xf32>
    %cst_28 = arith.constant 0.000000e+00 : f32
    %82 = vector.broadcast %cst_28 : f32 to vector<32x128xf32>
    %83 = arith.maximumf %81, %82 : vector<32x128xf32>
    %84 = arith.addf %83, %76 : vector<32x128xf32>
    %cst_29 = arith.constant dense<0.000000e+00> : vector<32xf32>
    %85 = vector.multi_reduction <add>, %84, %cst_29 [1] : vector<32x128xf32> to vector<32xf32>
    %86 = vector.shape_cast %85 : vector<32xf32> to vector<32x1xf32>
    %cst_30 = arith.constant 3.125000e-02 : f32
    %87 = vector.broadcast %cst_30 : f32 to vector<32x1xf32>
    %88 = arith.mulf %86, %87 : vector<32x1xf32>
    %89 = arith.mulf %84, %84 : vector<32x128xf32>
    %cst_31 = arith.constant dense<0.000000e+00> : vector<32xf32>
    %90 = vector.multi_reduction <add>, %89, %cst_31 [1] : vector<32x128xf32> to vector<32xf32>
    %91 = vector.shape_cast %90 : vector<32xf32> to vector<32x1xf32>
    %cst_32 = arith.constant 3.125000e-02 : f32
    %92 = vector.broadcast %cst_32 : f32 to vector<32x1xf32>
    %93 = arith.mulf %91, %92 : vector<32x1xf32>
    %94 = vector.broadcast %88 : vector<32x1xf32> to vector<32x128xf32>
    %95 = arith.subf %84, %94 : vector<32x128xf32>
    %96 = arith.mulf %88, %88 : vector<32x1xf32>
    %97 = arith.subf %93, %96 : vector<32x1xf32>
    %cst_33 = arith.constant 9.99999974E-6 : f32
    %98 = vector.broadcast %cst_33 : f32 to vector<32x1xf32>
    %99 = arith.addf %97, %98 : vector<32x1xf32>
    %100 = math.rsqrt %99 : vector<32x1xf32>
    %101 = vector.broadcast %100 : vector<32x1xf32> to vector<32x128xf32>
    %102 = arith.mulf %95, %101 : vector<32x128xf32>
    %103 = vector.broadcast %52 : vector<1x128xf32> to vector<32x128xf32>
    %104 = arith.mulf %102, %103 : vector<32x128xf32>
    %105 = vector.broadcast %53 : vector<1x128xf32> to vector<32x128xf32>
    %106 = arith.addf %104, %105 : vector<32x128xf32>
    %107 = vector.shape_cast %4 : vector<4x8x1xi1> to vector<32x1xi1>
    %cst_34 = arith.constant 0.000000e+00 : f32
    %108 = vector.shape_cast %107 : vector<32x1xi1> to vector<32x1xi1>
    %109 = vector.broadcast %108 : vector<32x1xi1> to vector<32x128xi1>
    %110 = vector.broadcast %cst_34 : f32 to vector<32x128xf32>
    %111 = arith.select %109, %106, %110 : vector<32x128xi1>, vector<32x128xf32>
    %112 = vector.shape_cast %111 : vector<32x128xf32> to vector<4x8x128xf32>
    %c0_35 = arith.constant 0 : index
    %c0_36 = arith.constant 0 : index
    %c0_37 = arith.constant 0 : index
    %113 = vector.load %arg6[%c0_35, %c0_36, %c0_37] : memref<4x8x128xf32, #tpu.memory_space<vmem>>, vector<4x8x128xf32>
    tpu.vector_store %arg6[%c0_35, %c0_36, %c0_37], %112 {strides = array<i32>} : memref<4x8x128xf32, #tpu.memory_space<vmem>>, vector<4x8x128xf32>,
    return
  }
  func.func @transform_0(%arg0: i32) -> (i32, i32, i32) {
    %c0_i32 = arith.constant 0 : i32
    %c0_i32_0 = arith.constant 0 : i32
    %c0_i32_1 = arith.constant 0 : i32
    return %arg0, %c0_i32, %c0_i32_0 : i32, i32, i32
  }
  func.func @transform_1(%arg0: i32) -> (i32, i32, i32) {
    %c0_i32 = arith.constant 0 : i32
    %c0_i32_0 = arith.constant 0 : i32
    %c0_i32_1 = arith.constant 0 : i32
    return %arg0, %c0_i32, %c0_i32_0 : i32, i32, i32
  }
  func.func @transform_2(%arg0: i32) -> (i32, i32) {
    %c0_i32 = arith.constant 0 : i32
    %c0_i32_0 = arith.constant 0 : i32
    %c0_i32_1 = arith.constant 0 : i32
    return %c0_i32, %c0_i32_0 : i32, i32
  }
  func.func @transform_3(%arg0: i32) -> (i32, i32) {
    %c0_i32 = arith.constant 0 : i32
    %c0_i32_0 = arith.constant 0 : i32
    %c0_i32_1 = arith.constant 0 : i32
    return %c0_i32, %c0_i32_0 : i32, i32
  }
  func.func @transform_4(%arg0: i32) -> (i32, i32) {
    %c0_i32 = arith.constant 0 : i32
    %c0_i32_0 = arith.constant 0 : i32
    %c0_i32_1 = arith.constant 0 : i32
    return %c0_i32, %c0_i32_0 : i32, i32
  }
  func.func @transform_5(%arg0: i32) -> (i32, i32, i32) {
    %c0_i32 = arith.constant 0 : i32
    %c0_i32_0 = arith.constant 0 : i32
    %c0_i32_1 = arith.constant 0 : i32
    return %arg0, %c0_i32, %c0_i32_0 : i32, i32, i32
  }
  func.func @transform_6(%arg0: i32) -> (i32, i32, i32) {
    %c0_i32 = arith.constant 0 : i32
    %c0_i32_0 = arith.constant 0 : i32
    %c0_i32_1 = arith.constant 0 : i32
    return %arg0, %c0_i32, %c0_i32_0 : i32, i32, i32
  }
}

</mosaic_0001>

<bundles_post_ra>
// kernel: self_attention_forward.1
= control target key start
LH: loop header
LB: loop body
LE: loop exit
PB: predicated region body
PF: predicated region fallthrough
CT: control target
= control target key end

     0   :  { %12 = vsyncpa [#allocation3], 0  ;;  %v29_v0 = vlaneseq  ;;  %v1419_v1 = vmov 0   ;;  %s1799_s0 = inlined_call_operand.vmem [shape: f32[4,8,128], index: 0, kind: input, shape index: {}]   ;;  %s1800_s1 = inlined_call_operand.vmem [shape: s32[4,1,1], index: 1, kind: input, shape index: {}]   ;;  %s1801_s2 = inlined_call_operand.vmem [shape: bf16[128,384], index: 2, kind: input, shape index: {}]   ;;  %s1802_s3 = inlined_call_operand.vmem [shape: bf16[128,128], index: 3, kind: input, shape index: {}]   ;;  %s1803_s4 = inlined_call_operand.vmem [shape: f32[5,128], index: 4, kind: input, shape index: {}]   ;;  %s1804_s5 = inlined_call_operand.hbm [shape: f32[4,8,128], index: 5, kind: output, shape index: {0}]   ;;  %s1805_s6 = inlined_call_operand.hbm [shape: bf16[4,8,8], index: 6, kind: output, shape index: {1}]  }
   0x1   :  { %1297 = vset.pattern.permute.xlu0 %v1419_v1  ;;  %v25_v2 = vld [vmem:[%s1800_s1] sm:$0x1]  ;;  %v26_v3 = vld [vmem:[%s1800_s1 + $0x1] sm:$0x1]  ;;  %1298 = vset.pattern.permute.xlu1 %v1419_v1  ;;  %v27_v4 = vld [vmem:[%s1800_s1 + $0x2] sm:$0x1] }
   0x2   :  { %v1475_v5 = vshrl.u32 %v29_v0, 7  ;;  %v1299_v6 = vld [vmem:[%s1801_s2 + $0x4] ss:$12 sps:$4 sm:$0xff]   ;;  %v1301_v7 = vld [vmem:[%s1801_s2] ss:$12 sps:$4 sm:$0xff]   ;;  %307 = vmatprep.mubr.bf16.mxu0 %v1419_v1 }
   0x3   :  { %v28_v8 = vld [vmem:[%s1800_s1 + $0x3] sm:$0x1]  ;;  %v1302_v9 = vld [vmem:[%s1801_s2 + $0x1c] ss:$12 sps:$4 sm:$0xff]   ;;  %275 = vmatprep.subr.bf16.mxu0 %v1299_v6  ;;  %v1304_v11 = vld [vmem:[%s1801_s2 + $0x18] ss:$12 sps:$4 sm:$0xff]  }
   0x4   :  { %v1491_v10 = vsub.s32 0, %v1475_v5  ;;  %276 = vmatpush1.bf16.msra.mxu0 %v1301_v7  ;;  %v1305_v16 = vld [vmem:[%s1801_s2 + $0x34] ss:$12 sps:$4 sm:$0xff]   ;;  %v1307_v20 = vld [vmem:[%s1801_s2 + $0x30] ss:$12 sps:$4 sm:$0xff]  }
   0x5   :  { %277 = vmatprep.subr.bf16.mxu0 %v1302_v9  ;;  %v1311_v17 = vld [vmem:[%s1801_s2 + $0x8] ss:$12 sps:$4 sm:$0xff]   ;;  %v1315_v21 = vld [vmem:[%s1801_s2 + $0x20] ss:$12 sps:$4 sm:$0xff]   ;;  %v1319_v25 = vld [vmem:[%s1801_s2 + $0x38] ss:$12 sps:$4 sm:$0xff]  }
   0x6   :  { %v36_v12 = vrot.slane %v25_v2, %v1491_v10  ;;  %v40_v13 = vrot.slane %v26_v3, %v1491_v10  ;;  %v44_v14 = vrot.slane %v27_v4, %v1491_v10  ;;  %v48_v15 = vrot.slane %v28_v8, %v1491_v10  ;;  %1200 = vmatprep.subr.bf16.mxu1 %v1311_v17  ;;  %v1308_v24 = vld [vmem:[%s1801_s2 + $0x4c] ss:$12 sps:$4 sm:$0xff]   ;;  %v1310_v26 = vld [vmem:[%s1801_s2 + $0x48] ss:$12 sps:$4 sm:$0xff]   ;;  %v1312_v27 = vld [vmem:[%s1801_s2 + $0x64] ss:$12 sps:$4 sm:$0xff]  }
   0x7   :  { %1201 = vmatpush3.bf16.msra.mxu1 %v1311_v17  ;;  %v1323_v28 = vld [vmem:[%s1801_s2 + $0x50] ss:$12 sps:$4 sm:$0xff]   ;;  %v1314_v29 = vld [vmem:[%s1801_s2 + $0x60] ss:$12 sps:$4 sm:$0xff]   ;;  %v1318_v31 = vld [vmem:[%s1801_s2 + $0x78] ss:$12 sps:$4 sm:$0xff]  }
   0x8   :  { %vm49_vm0 = vcmp.lt.s32.totalorder %v1475_v5, %v36_v12  ;;  %vm50_vm1 = vcmp.lt.s32.totalorder %v1475_v5, %v40_v13  ;;  %vm51_vm2 = vcmp.lt.s32.totalorder %v1475_v5, %v44_v14  ;;  %vm52_vm3 = vcmp.lt.s32.totalorder %v1475_v5, %v48_v15  ;;  %278 = vmatpush1.bf16.msra.mxu0 %v1304_v11  ;;  %v1316_v30 = vld [vmem:[%s1801_s2 + $0x7c] ss:$12 sps:$4 sm:$0xff]   ;;  %v1320_v33 = vld [vmem:[%s1801_s2 + $0x94] ss:$12 sps:$4 sm:$0xff]   ;;  %v1324_v36 = vld [vmem:[%s1801_s2 + $0xac] ss:$12 sps:$4 sm:$0xff]  }
   0x9   :  { %v89_v18 = vsel %vm49_vm0, 1, %v1419_v1  ;;  %v91_v19 = vsel %vm51_vm2, 1, %v1419_v1  ;;  %v90_v22 = vsel %vm50_vm1, 1, %v1419_v1  ;;  %v92_v23 = vsel %vm52_vm3, 1, %v1419_v1  ;;  %279 = vmatprep.subr.bf16.mxu0 %v1305_v16  ;;  %1202 = vmatprep.subr.bf16.mxu1 %v1315_v21  ;;  %v1327_v32 = vld [vmem:[%s1801_s2 + $0x68] ss:$12 sps:$4 sm:$0xff]  }
   0xa   :  { %94 = vperm.xlu0 %1297, %v89_v18   ;;  %100 = vperm.xlu1 %1298, %v91_v19   ;;  %v1328_v34 = vld [vmem:[%s1801_s2 + $0x80] ss:$12 sps:$4 sm:$0xff]   ;;  %v1322_v35 = vld [vmem:[%s1801_s2 + $0x90] ss:$12 sps:$4 sm:$0xff]  }
   0xb   :  { %1203 = vmatpush3.bf16.msra.mxu1 %v1315_v21 }
   0xc   :  { %280 = vmatpush1.bf16.msra.mxu0 %v1307_v20  ;;  %1204 = vmatprep.subr.bf16.mxu1 %v1319_v25 }
   0xd   :  { %281 = vmatprep.subr.bf16.mxu0 %v1308_v24 }
   0xe   :  { %97 = vperm.xlu0 %1297, %v90_v22   ;;  %103 = vperm.xlu1 %1298, %v92_v23  }
   0xf   :  { %1205 = vmatpush3.bf16.msra.mxu1 %v1319_v25 }
  0x10   :  { %282 = vmatpush1.bf16.msra.mxu0 %v1310_v26  ;;  %1206 = vmatprep.subr.bf16.mxu1 %v1323_v28 }
  0x11   :  { %283 = vmatprep.subr.bf16.mxu0 %v1312_v27 }
  0x12   :  { %54 = vperm.xlu0 %1297, %v25_v2   ;;  %61 = vperm.xlu1 %1298, %v26_v3  }
  0x13   :  { %1207 = vmatpush3.bf16.msra.mxu1 %v1323_v28 }
  0x14   :  { %284 = vmatpush1.bf16.msra.mxu0 %v1314_v29  ;;  %1208 = vmatprep.subr.bf16.mxu1 %v1327_v32 }
  0x15   :  { %285 = vmatprep.subr.bf16.mxu0 %v1316_v30 }
  0x16   :  { %68 = vperm.xlu0 %1297, %v27_v4   ;;  %75 = vperm.xlu1 %1298, %v28_v8  }
  0x17   :  { %1209 = vmatpush3.bf16.msra.mxu1 %v1327_v32 }
  0x18   :  { %286 = vmatpush1.bf16.msra.mxu0 %v1318_v31 }
  0x19   :  { %287 = vmatprep.subr.bf16.mxu0 %v1320_v33 }
  0x1a   :  { %13 = vsyncpa [#allocation5], 0  ;;  %1210 = vmatprep.subr.bf16.mxu1 %v1328_v34  ;;  %v1329_v37 = vld [vmem:[%s1801_s2 + $0x98] ss:$12 sps:$4 sm:$0xff]   ;;  %v1326_v38 = vld [vmem:[%s1801_s2 + $0xa8] ss:$12 sps:$4 sm:$0xff]  }
  0x1b   :  { %1211 = vmatpush3.bf16.msra.mxu1 %v1328_v34  ;;  %v1330_v39 = vld [vmem:[%s1801_s2 + $0xb0] ss:$12 sps:$4 sm:$0xff]   ;;  %v1573_v41 = vld [vmem:[%s1799_s0 + $0x8] sm:$0xff]  ;;  %v1590_v45 = vld [vmem:[%s1799_s0] sm:$0xff]  ;;  %v1420_v50 = vmov 0.0   ;;  %vm1421_vm10 = vmmov 0  }
  0x1c   :  { %288 = vmatpush1.bf16.msra.mxu0 %v1322_v35  ;;  %1212 = vmatprep.subr.bf16.mxu1 %v1329_v37  ;;  %v1580_v43 = vld [vmem:[%s1799_s0 + $0x10] sm:$0xff]  ;;  %v1585_v44 = vld [vmem:[%s1799_s0 + $0x18] sm:$0xff]  ;;  %v1141_v46 = vpack.c.bf16 %v1573_v41, %v1590_v45  ;;  %vm622_vm11 = vcmask 1043456   ;;  %v32_v20 = vand.u32 127, %v29_v0  ;;  %vm565_vm12 = vcmask 64512  }
  0x1d   :  { %289 = vmatprep.subr.bf16.mxu0 %v1324_v36  ;;  %v1144_v48 = vpack.c.bf16 %v1585_v44, %v1580_v43  ;;  %vm614_vm1 = vcmask 60416  }
  0x1f   :  { %1213 = vmatpush3.bf16.msra.mxu1 %v1329_v37 }
  0x20   :  { %290 = vmatpush1.bf16.msra.mxu0 %v1326_v38  ;;  %1214 = vmatprep.subr.bf16.mxu1 %v1330_v39 }
  0x21   :  { %1220 = vmatprep.subr.bf16.mxu0 %v1420_v50 }
  0x23   :  { %1215 = vmatpush3.bf16.msra.mxu1 %v1330_v39 }
  0x24   :  { %1232 = vmatprep.subr.bf16.mxu1 %v1420_v50 }
  0x89   :  { %v1568_v40 = vpop.permute.xlu0 %94  ;;  %v1575_v42 = vpop.permute.xlu1 %100 }
  0x8a   :  { %vm107_vm4 = vcmp.eq.s32.totalorder %v1575_v42, 1  ;;  %vm105_vm5 = vcmp.eq.s32.totalorder %v1568_v40, 1 }
  0x8d   :  { %v1594_v47 = vpop.permute.xlu0 %97  ;;  %v1599_v49 = vpop.permute.xlu1 %103 }
  0x8e   :  { %vm106_vm6 = vcmp.eq.s32.totalorder %v1594_v47, 1  ;;  %vm108_vm7 = vcmp.eq.s32.totalorder %v1599_v49, 1 }
  0x8f   :  { %vm1140_vm8 = vmpackc.low %vm106_vm6, %vm105_vm5 }
  0x90   :  { %1142 = vmatmul.mubr.msk.bf16.vlgmr.msra.gmra.mrb[0].mxu0 %vm1140_vm8, %v1141_v46  ;;  %1216 = vmatprep.mubr.msk.bf16.mxu1 %vm1140_vm8, %v1141_v46  ;;  %vm1143_vm9 = vmpackc.low %vm108_vm7, %vm107_vm4 }
  0x91   :  { %317 = vmatprep.mubr.bf16.mxu0 %v1419_v1  ;;  %1217 = vmatmul.mubr.msk.bf16.vlgmr.msra.gmra.mrb[0].mxu1 %vm1143_vm9, %v1144_v48  ;;  %v55_v18 = vpop.permute.xlu0 %54  ;;  %v62_v22 = vpop.permute.xlu1 %61 }
  0x92   :  { %1234 = vmatprep.mubr.msk.bf16.mxu1 %vm1421_vm10, %v1420_v50  ;;  %v59_v19 = vrot.slane %v55_v18, %v1491_v10  ;;  %v66_v31 = vrot.slane %v62_v22, %v1491_v10 }
  0x94   :  { %vm81_vm13 = vcmp.lt.s32.totalorder %v32_v20, %v59_v19  ;;  %vm82_vm14 = vcmp.lt.s32.totalorder %v32_v20, %v66_v31 }
  0x95   :  { %v69_v26 = vpop.permute.xlu0 %68  ;;  %v76_v32 = vpop.permute.xlu1 %75 }
  0x96   :  { %v73_v30 = vrot.slane %v69_v26, %v1491_v10 }
  0x98   :  { %1145 = vmatmul.mubr.msk.bf16.gmra.mrb[4].mxu0 %vm1143_vm9, %v1144_v48  ;;  %vm83_vm15 = vcmp.lt.s32.totalorder %v32_v20, %v73_v30 }
  0x99   :  { %1222 = vmatprep.mubr.msk.bf16.mxu0 %vm1421_vm10, %v1420_v50 }
 0x163   :  { %v309_v51 = vpop.f32.mrb[0].mxu0 }
 0x164   :  { %v311_v52 = vpop.f32.mrb[1].mxu0  ;;  %v1218_v53 = vpop.f32.mrb[0].mxu1  ;;  %v377_v2 = vpack.c.bf16 %v309_v51, %v309_v51 }
 0x165   :  { %v381_v54 = vpack.c.bf16 %v311_v52, %v311_v52  ;;  %v313_v55 = vpop.f32.mrb[2].mxu0  ;;  %v387_v56 = vpack.c.bf16 %v1218_v53, %v1218_v53  ;;  %v362_v57 = vpop.f32.mrb[1].mxu1 }
 0x166   :  { %v315_v58 = vpop.f32.mrb[3].mxu0  ;;  %v1219_v59 = vpop.f32.mrb[2].mxu1  ;;  %v385_v9 = vpack.c.bf16 %v362_v57, %v362_v57  ;;  %v378_v11 = vpack.c.bf16 %v313_v55, %v313_v55  ;;  %v80_v55 = vrot.slane %v76_v32, %v1491_v10 }
 0x167   :  { %1221 = vmatpush3.bf16.xpose.msra.mxu0 %v381_v54  ;;  %v1620_v60 = vsel %vm622_vm11, %v387_v56, 0  ;;  %v388_v61 = vpack.c.bf16 %v1219_v59, %v1219_v59  ;;  %v365_v62 = vpop.f32.mrb[3].mxu1  ;;  %v382_v4 = vpack.c.bf16 %v315_v58, %v315_v58 }
 0x168   :  { %1226 = vmatprep.subr.bf16.mxu0 %v1420_v50  ;;  %v624_v14 = vsel %vm622_vm11, %v385_v9, 0  ;;  %v386_v15 = vpack.c.bf16 %v365_v62, %v365_v62  ;;  %vm84_vm0 = vcmp.lt.s32.totalorder %v32_v20, %v80_v55 }
 0x169   :  { %v1624_v63 = vsel %vm622_vm11, %v388_v61, 0 }
 0x16a   :  { %v670_v17 = vsel %vm622_vm11, %v386_v15, 0 }
 0x16b   :  { %v319_v1 = vpop.f32.mrb[4].mxu0 }
 0x16c   :  { %v321_v3 = vpop.f32.mrb[5].mxu0  ;;  %v379_v12 = vpack.c.bf16 %v319_v1, %v319_v1 }
 0x16d   :  { %v383_v6 = vpack.c.bf16 %v321_v3, %v321_v3  ;;  %v323_v7 = vpop.f32.mrb[6].mxu0 }
 0x16e   :  { %1223 = vmatmul.mubr.bf16.vlgmr.msra.gmra.mrb[8].mxu0 %v377_v2  ;;  %v325_v8 = vpop.f32.mrb[7].mxu0  ;;  %v380_v16 = vpack.c.bf16 %v323_v7, %v323_v7 }
 0x16f   :  { %1227 = vmatpush3.bf16.xpose.msra.mxu0 %v382_v4  ;;  %1233 = vmatpush3.bf16.xpose.msra.mxu1 %v383_v6  ;;  %v384_v13 = vpack.c.bf16 %v325_v8, %v325_v8 }
 0x170   :  { %1228 = vmatprep.mubr.msk.bf16.mxu0 %vm1421_vm10, %v1420_v50  ;;  %1238 = vmatprep.subr.bf16.mxu0 %v1420_v50 }
 0x171   :  { %1244 = vmatprep.subr.bf16.mxu1 %v1420_v50 }
 0x176   :  { %1229 = vmatmul.mubr.bf16.vlgmr.msra.gmra.mrb[12].mxu0 %v378_v11  ;;  %1235 = vmatmul.mubr.bf16.vlgmr.msra.gmra.mrb[4].mxu1 %v379_v12 }
 0x177   :  { %1239 = vmatpush3.bf16.xpose.msra.mxu0 %v384_v13  ;;  %1245 = vmatpush3.bf16.msra.mxu1 %v624_v14 }
 0x178   :  { %1240 = vmatprep.mubr.msk.bf16.mxu0 %vm1421_vm10, %v1420_v50  ;;  %1250 = vmatprep.subr.bf16.mxu0 %v1420_v50 }
 0x179   :  { %1246 = vmatprep.mubr.msk.bf16.mxu1 %vm1421_vm10, %v1420_v50  ;;  %1256 = vmatprep.subr.bf16.mxu1 %v1420_v50 }
 0x17e   :  { %1241 = vmatmul.mubr.bf16.vlgmr.msra.gmra.mrb[16].mxu0 %v380_v16 }
 0x17f   :  { %1251 = vmatpush3.bf16.msra.mxu0 %v670_v17  ;;  %1252 = vmatprep.mubr.msk.bf16.mxu0 %vm1421_vm10, %v1420_v50 }
 0x180   :  { %1262 = vmatprep.subr.bf16.mxu0 %v1420_v50 }
 0x241   :  { %v423_v21 = vpop.f32.mrb[8].mxu0 }
 0x242   :  { %v549_v23 = vmul.f32 0.17677669, %v423_v21  ;;  %v1224_v24 = vpop.f32.mrb[9].mxu0 }
 0x243   :  { %v426_v25 = vpop.f32.mrb[10].mxu0 }
 0x244   :  { %v1225_v27 = vpop.f32.mrb[11].mxu0  ;;  %v561_v28 = vsel %vm81_vm13, %v549_v23, -inf }
 0x245   :  { %v566_v29 = vsel %vm565_vm12, %v561_v28, -inf }
 0x246   :  { %567 = vmax.xlane.f32.xlu0 %v566_v29 }
 0x249   :  { %v463_v33 = vpop.f32.mrb[12].mxu0  ;;  %v503_v0 = vpop.f32.mrb[4].mxu1 }
 0x24a   :  { %v550_v34 = vmul.f32 0.17677669, %v463_v33  ;;  %v551_v35 = vmul.f32 0.17677669, %v503_v0  ;;  %v1230_v36 = vpop.f32.mrb[13].mxu0  ;;  %v1236_v37 = vpop.f32.mrb[5].mxu1 }
 0x24b   :  { %v466_v38 = vpop.f32.mrb[14].mxu0  ;;  %v506_v39 = vpop.f32.mrb[6].mxu1 }
 0x24c   :  { %v1231_v46 = vpop.f32.mrb[15].mxu0  ;;  %v1237_v48 = vpop.f32.mrb[7].mxu1  ;;  %v562_v51 = vsel %vm82_vm14, %v550_v34, -inf  ;;  %v563_v52 = vsel %vm83_vm15, %v551_v35, -inf }
 0x24d   :  { %v569_v53 = vsel %vm565_vm12, %v562_v51, -inf  ;;  %v572_v54 = vsel %vm565_vm12, %v563_v52, -inf  ;;  %v109_v48 = vsel %vm105_vm5, %v1590_v45, 0.0 }
 0x24e   :  { %570 = vmax.xlane.f32.xlu1 %v569_v53  ;;  %573 = vmax.xlane.f32.xlu0 %v572_v54 }
 0x251   :  { %v543_v56 = vpop.f32.mrb[16].mxu0 }
 0x252   :  { %v552_v57 = vmul.f32 0.17677669, %v543_v56  ;;  %v1242_v58 = vpop.f32.mrb[17].mxu0 }
 0x253   :  { %v546_v59 = vpop.f32.mrb[18].mxu0 }
 0x254   :  { %v1243_v61 = vpop.f32.mrb[19].mxu0  ;;  %v564_v62 = vsel %vm84_vm0, %v552_v57, -inf  ;;  %v110_v57 = vsel %vm106_vm6, %v1573_v41, 0.0 }
 0x255   :  { %v575_v1 = vsel %vm565_vm12, %v564_v62, -inf  ;;  %v111_v61 = vsel %vm107_vm4, %v1580_v43, 0.0 }
 0x256   :  { %576 = vmax.xlane.f32.xlu0 %v575_v1 }
 0x2d3   :  { %v568_v2 = vpop.xlane.xlu0 %567 }
 0x2d4   :  { %v578_v3 = vsub.f32 %v561_v28, %v568_v2 }
 0x2d6   :  { %v582_v4 = vmul.f32 1.442695, %v578_v3 }
 0x2d8   :  { %1339 = vpow2.f32 %v582_v4 }
 0x2db   :  { %v571_v6 = vpop.xlane.xlu1 %570  ;;  %v574_v7 = vpop.xlane.xlu0 %573 }
 0x2dc   :  { %v579_v8 = vsub.f32 %v562_v51, %v571_v6  ;;  %v580_v9 = vsub.f32 %v563_v52, %v574_v7 }
 0x2de   :  { %v584_v11 = vmul.f32 1.442695, %v579_v8  ;;  %v586_v12 = vmul.f32 1.442695, %v580_v9  ;;  %v112_v9 = vsel %vm108_vm7, %v1585_v44, 0.0  ;;  %v1332_v44 = vld [vmem:[%s1802_s3 + $0x8] sm:$0xff]  }
 0x2e0   :  { %1341 = vpow2.f32 %v584_v11 }
 0x2e1   :  { %1343 = vpow2.f32 %v586_v12 }
 0x2e2   :  { %v1340_v13 = vpop.eup %1339 }
 0x2e3   :  { %v577_v14 = vpop.xlane.xlu0 %576  ;;  %v590_v15 = vsel %vm565_vm12, %v1340_v13, 0.0 }
 0x2e4   :  { %v581_v16 = vsub.f32 %v564_v62, %v577_v14  ;;  %591 = vadd.xlane.f32.xlu1 %v590_v15  ;;  %v1331_v15 = vld [vmem:[%s1802_s3] sm:$0xff]  }
 0x2e6   :  { %v588_v17 = vmul.f32 1.442695, %v581_v16  ;;  %v1333_v16 = vld [vmem:[%s1802_s3 + $0x10] sm:$0xff]  }
 0x2e8   :  { %1345 = vpow2.f32 %v588_v17  ;;  %v1334_v17 = vld [vmem:[%s1802_s3 + $0x18] sm:$0xff]  }
 0x2ea   :  { %v1342_v18 = vpop.eup %1341 }
 0x2eb   :  { %v1344_v19 = vpop.eup %1343  ;;  %v593_v20 = vsel %vm565_vm12, %v1342_v18, 0.0 }
 0x2ec   :  { %594 = vadd.xlane.f32.xlu0 %v593_v20  ;;  %v596_v21 = vsel %vm565_vm12, %v1344_v19, 0.0  ;;  %v1337_v20 = vld [vmem:[%s1802_s3 + $0x30] sm:$0xff]  }
 0x2ed   :  { %597 = vadd.xlane.f32.xlu1 %v596_v21  ;;  %v1338_v21 = vld [vmem:[%s1802_s3 + $0x38] sm:$0xff]  }
 0x2f2   :  { %v1346_v22 = vpop.eup %1345 }
 0x2f3   :  { %v599_v23 = vsel %vm565_vm12, %v1346_v22, 0.0 }
 0x2f4   :  { %600 = vadd.xlane.f32.xlu0 %v599_v23 }
 0x371   :  { %v592_v24 = vpop.xlane.xlu1 %591 }
 0x372   :  { %1347 = vrcp.f32 %v592_v24 }
 0x379   :  { %v595_v25 = vpop.xlane.xlu0 %594 }
 0x37a   :  { %v598_v26 = vpop.xlane.xlu1 %597  ;;  %1349 = vrcp.f32 %v595_v25 }
 0x37b   :  { %1351 = vrcp.f32 %v598_v26 }
 0x37c   :  { %v1348_v27 = vpop.eup %1347 }
 0x37d   :  { %v606_v28 = vmul.f32 %v1348_v27, %v1340_v13 }
 0x37f   :  { %v610_v29 = vpack.c.bf16 %v606_v28, %v606_v28 }
 0x381   :  { %615 = vst.msk [vmem:[#allocation4] sm:$0xf] %vm614_vm1, %v610_v29  ;;  %1247 = vmatmul.mubr.msk.bf16.vlgmr.msra.gmra.mrb[8].mxu1 %vm565_vm12, %v610_v29  ;;  %v601_v30 = vpop.xlane.xlu0 %600 }
 0x382   :  { %1257 = vmatpush3.bf16.msra.mxu1 %v1620_v60  ;;  %1353 = vrcp.f32 %v601_v30  ;;  %1258 = vmatprep.mubr.msk.bf16.mxu1 %vm1421_vm10, %v1420_v50 }
 0x383   :  { %1268 = vmatprep.subr.bf16.mxu1 %v1331_v15 }
 0x384   :  { %v1350_v31 = vpop.eup %1349 }
 0x385   :  { %v1352_v32 = vpop.eup %1351  ;;  %v607_v33 = vmul.f32 %v1350_v31, %v1342_v18  ;;  %v1335_v18 = vld [vmem:[%s1802_s3 + $0x20] sm:$0xff]  }
 0x386   :  { %v608_v0 = vmul.f32 %v1352_v32, %v1344_v19  ;;  %v1336_v19 = vld [vmem:[%s1802_s3 + $0x28] sm:$0xff]  }
 0x387   :  { %v611_v34 = vpack.c.bf16 %v607_v33, %v607_v33 }
 0x388   :  { %v612_v35 = vpack.c.bf16 %v608_v0, %v608_v0 }
 0x389   :  { %616 = vst.msk [vmem:[#allocation4 + $0x4] sm:$0xf] %vm614_vm1, %v611_v34  ;;  %1253 = vmatmul.mubr.msk.bf16.vlgmr.msra.gmra.mrb[20].mxu0 %vm565_vm12, %v611_v34 }
 0x38a   :  { %617 = vst.msk [vmem:[#allocation4 + $0x8] sm:$0xf] %vm614_vm1, %v612_v35  ;;  %1259 = vmatmul.mubr.msk.bf16.vlgmr.msra.gmra.mrb[12].mxu1 %vm565_vm12, %v612_v35  ;;  %1263 = vmatpush3.bf16.msra.mxu0 %v1624_v63 }
 0x38b   :  { %1264 = vmatprep.mubr.msk.bf16.mxu0 %vm1421_vm10, %v1420_v50  ;;  %1269 = vmatpush3.bf16.msra.mxu1 %v1331_v15 }
 0x38c   :  { %v1354_v60 = vpop.eup %1353  ;;  %1270 = vmatprep.subr.bf16.mxu1 %v1332_v44 }
 0x38d   :  { %v609_v36 = vmul.f32 %v1354_v60, %v1346_v22 }
 0x38f   :  { %v613_v37 = vpack.c.bf16 %v609_v36, %v609_v36  ;;  %1271 = vmatpush3.bf16.msra.mxu1 %v1332_v44 }
 0x390   :  { %1272 = vmatprep.subr.bf16.mxu1 %v1333_v16 }
 0x391   :  { %618 = vst.msk [vmem:[#allocation4 + $0xc] sm:$0xf] %vm614_vm1, %v613_v37  ;;  %1265 = vmatmul.mubr.msk.bf16.vlgmr.msra.gmra.mrb[24].mxu0 %vm565_vm12, %v613_v37 }
 0x393   :  { %1273 = vmatpush3.bf16.msra.mxu1 %v1333_v16 }
 0x394   :  { %1274 = vmatprep.subr.bf16.mxu1 %v1334_v17 }
 0x397   :  { %1275 = vmatpush3.bf16.msra.mxu1 %v1334_v17 }
 0x398   :  { %1276 = vmatprep.subr.bf16.mxu1 %v1335_v18 }
 0x39b   :  { %1277 = vmatpush3.bf16.msra.mxu1 %v1335_v18 }
 0x39c   :  { %1278 = vmatprep.subr.bf16.mxu1 %v1336_v19 }
 0x39f   :  { %1279 = vmatpush3.bf16.msra.mxu1 %v1336_v19 }
 0x3a0   :  { %1280 = vmatprep.subr.bf16.mxu1 %v1337_v20 }
 0x3a3   :  { %1281 = vmatpush3.bf16.msra.mxu1 %v1337_v20 }
 0x3a4   :  { %1282 = vmatprep.subr.bf16.mxu1 %v1338_v21 }
 0x3a7   :  { %1283 = vmatpush3.bf16.msra.mxu1 %v1338_v21 }
 0x454   :  { %v660_v38 = vpop.f32.mrb[8].mxu1 }
 0x455   :  { %v804_v39 = vmax.f32 %v660_v38, 0.0  ;;  %v1248_v46 = vpop.f32.mrb[9].mxu1 }
 0x456   :  { %v663_v51 = vpop.f32.mrb[10].mxu1 }
 0x457   :  { %v1671_v52 = vadd.f32 %v804_v39, %v109_v48  ;;  %v1249_v63 = vpop.f32.mrb[11].mxu1 }
 0x459   :  { %813 = vadd.xlane.f32.xlu1 %v1671_v52  ;;  %v825_v50 = vmul.f32 %v1671_v52, %v1671_v52 }
 0x45c   :  { %v706_v53 = vpop.f32.mrb[20].mxu0 }
 0x45d   :  { %v805_v54 = vmax.f32 %v706_v53, 0.0  ;;  %v752_v55 = vpop.f32.mrb[12].mxu1  ;;  %829 = vadd.xlane.f32.xlu1 %v825_v50  ;;  %v1254_v56 = vpop.f32.mrb[21].mxu0 }
 0x45e   :  { %v806_v58 = vmax.f32 %v752_v55, 0.0  ;;  %v1260_v45 = vpop.f32.mrb[13].mxu1  ;;  %v709_v59 = vpop.f32.mrb[22].mxu0 }
 0x45f   :  { %v1682_v62 = vadd.f32 %v805_v54, %v110_v57  ;;  %v755_v1 = vpop.f32.mrb[14].mxu1  ;;  %v1255_v2 = vpop.f32.mrb[23].mxu0  ;;  %v867_v54 = vsub.s32 1, %v1475_v5  ;;  %v1728_v57 = vld [vmem:[%s1803_s4] sm:$0x1f]  ;;  %s1422_s4 = smov [#allocation4]  }
 0x460   :  { %v1684_v3 = vadd.f32 %v806_v58, %v111_v61  ;;  %v1261_v4 = vpop.f32.mrb[15].mxu1  ;;  %v875_v1 = vsub.s32 2, %v1475_v5  ;;  %v902_v21 = vrot.slane %v1728_v57, %v1491_v10  ;;  %s1101_s25 = sshll.u32 %s1422_s4, 4  ;;  %s1102_s25 = int_to_ptr.vmem [resolvable:$true] %s1101_s25 }
 0x461   :  { %815 = vadd.xlane.f32.xlu0 %v1682_v62  ;;  %v826_v41 = vmul.f32 %v1682_v62, %v1682_v62  ;;  %v868_v61 = vrot.slane %v1728_v57, %v867_v54  ;;  %s1371_s26 = scalar_lea.vmem %s1102_s25, 256  ;;  %p1376_p1 = scmp.lt.s32.totalorder %s1102_s25, %s1102_s25 }
 0x462   :  { %817 = vadd.xlane.f32.xlu1 %v1684_v3  ;;  %v827_v7 = vmul.f32 %v1684_v3, %v1684_v3  ;;  %p1372_p0 = scmp.ne.s32.totalorder %s1102_s25, %s1371_s26  ;;  %p1377_p2 = scmp.lt.s32.totalorder %s1371_s26, %s1371_s26 }
 0x464   :  { %v798_v6 = vpop.f32.mrb[24].mxu0  ;;  %p1378_p3 = por %p1377_p2, %p1376_p1 }
 0x465   :  { %v807_v8 = vmax.f32 %v798_v6, 0.0  ;;  %831 = vadd.xlane.f32.xlu0 %v826_v41  ;;  %v1266_v43 = vpop.f32.mrb[25].mxu0 }
 0x466   :  { %833 = vadd.xlane.f32.xlu1 %v827_v7  ;;  %v801_v11 = vpop.f32.mrb[26].mxu0  ;;  %v876_v7 = vrot.slane %v1728_v57, %v875_v1  ;;  %p1379_p4 = pnand %p1378_p3, %p1372_p0 }
 0x467   :  { %v1695_v12 = vadd.f32 %v807_v8, %v112_v9  ;;  %v1267_v13 = vpop.f32.mrb[27].mxu0 }
 0x469   :  { %819 = vadd.xlane.f32.xlu0 %v1695_v12  ;;  %v828_v14 = vmul.f32 %v1695_v12, %v1695_v12 }
 0x46d   :  { %835 = vadd.xlane.f32.xlu0 %v828_v14 }
 0x4e6   :  { %v814_v22 = vpop.xlane.xlu1 %813 }
 0x4e7   :  { %v821_v23 = vmul.f32 0.03125, %v814_v22 }
 0x4e9   :  { %v845_v25 = vmul.f32 %v821_v23, %v821_v23  ;;  %v841_v58 = vsub.f32 %v1671_v52, %v821_v23 }
 0x4ea   :  { %v830_v24 = vpop.xlane.xlu1 %829 }
 0x4eb   :  { %v837_v26 = vmul.f32 0.03125, %v830_v24 }
 0x4ed   :  { %v849_v27 = vsub.f32 %v837_v26, %v845_v25 }
 0x4ee   :  { %v816_v28 = vpop.xlane.xlu0 %815 }
 0x4ef   :  { %v853_v29 = vadd.f32 1e-05, %v849_v27  ;;  %v818_v30 = vpop.xlane.xlu1 %817  ;;  %v822_v31 = vmul.f32 0.03125, %v816_v28 }
 0x4f0   :  { %v823_v32 = vmul.f32 0.03125, %v818_v30 }
 0x4f1   :  { %1355 = vrsqrt.f32 %v853_v29  ;;  %v846_v0 = vmul.f32 %v822_v31, %v822_v31  ;;  %v842_v2 = vsub.f32 %v1682_v62, %v822_v31 }
 0x4f2   :  { %v832_v33 = vpop.xlane.xlu0 %831  ;;  %v847_v60 = vmul.f32 %v823_v32, %v823_v32  ;;  %v843_v43 = vsub.f32 %v1684_v3, %v823_v32 }
 0x4f3   :  { %v834_v34 = vpop.xlane.xlu1 %833  ;;  %v838_v35 = vmul.f32 0.03125, %v832_v33 }
 0x4f4   :  { %v839_v36 = vmul.f32 0.03125, %v834_v34 }
 0x4f5   :  { %v850_v37 = vsub.f32 %v838_v35, %v846_v0 }
 0x4f6   :  { %v851_v38 = vsub.f32 %v839_v36, %v847_v60  ;;  %v820_v39 = vpop.xlane.xlu0 %819 }
 0x4f7   :  { %v854_v46 = vadd.f32 1e-05, %v850_v37  ;;  %v824_v48 = vmul.f32 0.03125, %v820_v39 }
 0x4f8   :  { %v855_v51 = vadd.f32 1e-05, %v851_v38 }
 0x4f9   :  { %1357 = vrsqrt.f32 %v854_v46  ;;  %v848_v50 = vmul.f32 %v824_v48, %v824_v48  ;;  %v844_v14 = vsub.f32 %v1695_v12, %v824_v48 }
 0x4fa   :  { %v836_v63 = vpop.xlane.xlu0 %835  ;;  %1359 = vrsqrt.f32 %v855_v51 }
 0x4fb   :  { %v840_v53 = vmul.f32 0.03125, %v836_v63  ;;  %v1356_v55 = vpop.eup %1355 }
 0x4fc   :  { %v861_v59 = vmul.f32 %v1356_v55, %v841_v58 }
 0x4fd   :  { %v852_v56 = vsub.f32 %v840_v53, %v848_v50 }
 0x4fe   :  { %v869_v6 = vmul.f32 %v868_v61, %v861_v59 }
 0x4ff   :  { %v856_v45 = vadd.f32 1e-05, %v852_v56 }
 0x500   :  { %v877_v11 = vadd.f32 %v876_v7, %v869_v6 }
 0x501   :  { %1361 = vrsqrt.f32 %v856_v45 }
 0x503   :  { %v1358_v4 = vpop.eup %1357 }
 0x504   :  { %v862_v41 = vmul.f32 %v1358_v4, %v842_v2  ;;  %v1360_v8 = vpop.eup %1359 }
 0x505   :  { %v863_v13 = vmul.f32 %v1360_v8, %v843_v43 }
 0x506   :  { %v870_v9 = vmul.f32 %v868_v61, %v862_v41 }
 0x507   :  { %v871_v17 = vmul.f32 %v868_v61, %v863_v13 }
 0x508   :  { %v878_v52 = vadd.f32 %v876_v7, %v870_v9 }
 0x509   :  { %v879_v18 = vadd.f32 %v876_v7, %v871_v17 }
 0x50a   :  { %v881_v15 = vpack.c.bf16 %v878_v52, %v877_v11 }
 0x50b   :  { %v1362_v44 = vpop.eup %1361 }
 0x50c   :  { %1284 = vmatprep.mubr.bf16.mxu1 %v881_v15  ;;  %v864_v16 = vmul.f32 %v1362_v44, %v844_v14 }
 0x50e   :  { %v872_v62 = vmul.f32 %v868_v61, %v864_v16 }
 0x510   :  { %v880_v19 = vadd.f32 %v876_v7, %v872_v62 }
 0x512   :  { %v882_v20 = vpack.c.bf16 %v880_v19, %v879_v18 }
 0x514   :  { %1285 = vmatmul.mubr.bf16.vlgmr.msra.gmra.mrb[16].mxu1 %v882_v20 }
 0x5e7   :  { %v1286_v3 = vpop.f32.mrb[16].mxu1 }
 0x5e8   :  { %v994_v22 = vadd.f32 %v1286_v3, %v902_v21  ;;  %v985_v23 = vpop.f32.mrb[17].mxu1 }
 0x5e9   :  { %v986_v24 = vadd.f32 %v985_v23, %v902_v21  ;;  %v1287_v25 = vpop.f32.mrb[18].mxu1 }
 0x5ea   :  { %v1002_v26 = vmax.f32 %v994_v22, 0.0  ;;  %v997_v12 = vadd.f32 %v1287_v25, %v902_v21  ;;  %v988_v27 = vpop.f32.mrb[19].mxu1 }
 0x5eb   :  { %v989_v28 = vadd.f32 %v988_v27, %v902_v21  ;;  %v1000_v30 = vmax.f32 %v986_v24, 0.0 }
 0x5ec   :  { %v1739_v29 = vadd.f32 %v1002_v26, %v879_v18  ;;  %v1003_v31 = vmax.f32 %v997_v12, 0.0 }
 0x5ed   :  { %v1001_v33 = vmax.f32 %v989_v28, 0.0  ;;  %v1744_v0 = vadd.f32 %v1000_v30, %v877_v11 }
 0x5ee   :  { %v1741_v32 = vadd.f32 %v1003_v31, %v880_v19  ;;  %1012 = vadd.xlane.f32.xlu1 %v1739_v29  ;;  %v1022_v60 = vmul.f32 %v1739_v29, %v1739_v29 }
 0x5ef   :  { %v1747_v10 = vadd.f32 %v1001_v33, %v878_v52  ;;  %v1020_v34 = vmul.f32 %v1744_v0, %v1744_v0 }
 0x5f0   :  { %1014 = vadd.xlane.f32.xlu0 %v1741_v32  ;;  %v1023_v36 = vmul.f32 %v1741_v32, %v1741_v32 }
 0x5f1   :  { %v1021_v35 = vmul.f32 %v1747_v10, %v1747_v10 }
 0x5f2   :  { %1008 = vadd.xlane.f32.xlu1 %v1744_v0 }
 0x5f4   :  { %1010 = vadd.xlane.f32.xlu0 %v1747_v10 }
 0x5f6   :  { %1024 = vadd.xlane.f32.xlu1 %v1020_v34 }
 0x5f8   :  { %1026 = vadd.xlane.f32.xlu0 %v1021_v35 }
 0x5fa   :  { %1028 = vadd.xlane.f32.xlu1 %v1022_v60 }
 0x5fc   :  { %1030 = vadd.xlane.f32.xlu0 %v1023_v36 }
 0x5fd   :  { %1382 = shalt.err (!%p1379_p4)
}
 0x5fe   :  { %s1383_s29 = scalar_lea.hbm %s1805_s6, 256 }
 0x5ff   :  { %p1384_p5 = scmp.ne.s32.totalorder %s1805_s6, %s1383_s29  ;;  %p1387_p6 = scmp.lt.u32.totalorder %s1383_s29, %s1805_s6 }
 0x601   :  { %p1389_p7 = pnand %p1387_p6, %p1384_p5 }
 0x603   :  { %1392 = shalt.err (!%p1389_p7)
}
 0x604   :  { %s1423_s9 = smov 64   ;;  %s1424_s0 = smov 4   ;;  %v1062_v14 = vsub.s32 3, %v1475_v5  ;;  %v1070_v15 = vsub.s32 4, %v1475_v5 }
 0x605   :  { %1107 = dma.vmem_to_hbm [thread:$0]  %s1102_s25, 256, %s1805_s6, [#allocation5], %s1423_s9, %s1423_s9, %s1424_s0  }
 0x606   :  { %v1063_v16 = vrot.slane %v1728_v57, %v1062_v14  ;;  %v1071_v19 = vrot.slane %v1728_v57, %v1070_v15  ;;  %s1425_s6 = smov [#allocation2]  }
 0x607   :  { %s1089_s12 = sshll.u32 %s1425_s6, 4  ;;  %s1090_s12 = int_to_ptr.vmem [resolvable:$true] %s1089_s12 }
 0x608   :  { %s1393_s1 = scalar_lea.vmem %s1090_s12, 512  ;;  %p1398_p9 = scmp.lt.s32.totalorder %s1090_s12, %s1090_s12 }
 0x609   :  { %p1394_p8 = scmp.ne.s32.totalorder %s1090_s12, %s1393_s1  ;;  %p1399_p10 = scmp.lt.s32.totalorder %s1393_s1, %s1393_s1 }
 0x60b   :  { %p1400_p11 = por %p1399_p10, %p1398_p9 }
 0x60d   :  { %p1401_p12 = pnand %p1400_p11, %p1394_p8 }
 0x67b   :  { %v1013_v37 = vpop.xlane.xlu1 %1012 }
 0x67c   :  { %v1018_v50 = vmul.f32 0.03125, %v1013_v37 }
 0x67d   :  { %v1015_v38 = vpop.xlane.xlu0 %1014 }
 0x67e   :  { %v1019_v55 = vmul.f32 0.03125, %v1015_v38  ;;  %v1042_v1 = vmul.f32 %v1018_v50, %v1018_v50  ;;  %v1038_v21 = vsub.f32 %v1739_v29, %v1018_v50 }
 0x67f   :  { %v1009_v39 = vpop.xlane.xlu1 %1008 }
 0x680   :  { %v1016_v46 = vmul.f32 0.03125, %v1009_v39  ;;  %v1043_v6 = vmul.f32 %v1019_v55, %v1019_v55  ;;  %v1039_v24 = vsub.f32 %v1741_v32, %v1019_v55 }
 0x681   :  { %v1011_v48 = vpop.xlane.xlu0 %1010 }
 0x682   :  { %v1017_v51 = vmul.f32 0.03125, %v1011_v48  ;;  %v1040_v53 = vmul.f32 %v1016_v46, %v1016_v46  ;;  %v1036_v44 = vsub.f32 %v1744_v0, %v1016_v46 }
 0x683   :  { %v1025_v63 = vpop.xlane.xlu1 %1024 }
 0x684   :  { %v1032_v54 = vmul.f32 0.03125, %v1025_v63  ;;  %v1041_v58 = vmul.f32 %v1017_v51, %v1017_v51  ;;  %v1037_v62 = vsub.f32 %v1747_v10, %v1017_v51 }
 0x685   :  { %v1027_v56 = vpop.xlane.xlu0 %1026 }
 0x686   :  { %v1044_v45 = vsub.f32 %v1032_v54, %v1040_v53  ;;  %v1033_v59 = vmul.f32 0.03125, %v1027_v56 }
 0x687   :  { %v1029_v61 = vpop.xlane.xlu1 %1028 }
 0x688   :  { %v1048_v2 = vadd.f32 1e-05, %v1044_v45  ;;  %v1045_v4 = vsub.f32 %v1033_v59, %v1041_v58  ;;  %v1034_v41 = vmul.f32 0.03125, %v1029_v61 }
 0x689   :  { %v1031_v7 = vpop.xlane.xlu0 %1030 }
 0x68a   :  { %1363 = vrsqrt.f32 %v1048_v2  ;;  %v1049_v8 = vadd.f32 1e-05, %v1045_v4  ;;  %v1046_v43 = vsub.f32 %v1034_v41, %v1042_v1  ;;  %v1035_v9 = vmul.f32 0.03125, %v1031_v7 }
 0x68c   :  { %1365 = vrsqrt.f32 %v1049_v8  ;;  %v1050_v11 = vadd.f32 1e-05, %v1046_v43  ;;  %v1047_v52 = vsub.f32 %v1035_v9, %v1043_v6 }
 0x68e   :  { %1367 = vrsqrt.f32 %v1050_v11  ;;  %v1051_v13 = vadd.f32 1e-05, %v1047_v52 }
 0x690   :  { %1369 = vrsqrt.f32 %v1051_v13 }
 0x694   :  { %v1364_v17 = vpop.eup %1363 }
 0x695   :  { %v1056_v18 = vmul.f32 %v1364_v17, %v1036_v44 }
 0x696   :  { %v1366_v20 = vpop.eup %1365 }
 0x697   :  { %v1057_v3 = vmul.f32 %v1366_v20, %v1037_v62  ;;  %v1064_v22 = vmul.f32 %v1063_v16, %v1056_v18 }
 0x698   :  { %v1368_v23 = vpop.eup %1367 }
 0x699   :  { %v1058_v25 = vmul.f32 %v1368_v23, %v1038_v21  ;;  %v1065_v5 = vmul.f32 %v1063_v16, %v1057_v3  ;;  %v1072_v26 = vadd.f32 %v1071_v19, %v1064_v22 }
 0x69a   :  { %v1370_v12 = vpop.eup %1369 }
 0x69b   :  { %v1066_v27 = vmul.f32 %v1063_v16, %v1058_v25  ;;  %v1059_v28 = vmul.f32 %v1370_v12, %v1039_v24  ;;  %v1073_v30 = vadd.f32 %v1071_v19, %v1065_v5  ;;  %v1076_v31 = vsel %vm105_vm5, %v1072_v26, 0.0 }
 0x69c   :  { %1080 = vst [vmem:[#allocation2] sm:$0xff] %v1076_v31 }
 0x69d   :  { %v1067_v57 = vmul.f32 %v1063_v16, %v1059_v28  ;;  %v1074_v33 = vadd.f32 %v1071_v19, %v1066_v27  ;;  %v1077_v29 = vsel %vm106_vm6, %v1073_v30, 0.0 }
 0x69e   :  { %1081 = vst [vmem:[#allocation2 + $0x8] sm:$0xff] %v1077_v29 }
 0x69f   :  { %v1075_v32 = vadd.f32 %v1071_v19, %v1067_v57  ;;  %v1078_v0 = vsel %vm107_vm4, %v1074_v33, 0.0 }
 0x6a0   :  { %1082 = vst [vmem:[#allocation2 + $0x10] sm:$0xff] %v1078_v0 }
 0x6a1   :  { %v1079_v10 = vsel %vm108_vm7, %v1075_v32, 0.0 }
 0x6a2   :  { %1083 = vst [vmem:[#allocation2 + $0x18] sm:$0xff] %v1079_v10 }
 0x6a3   :  { %1404 = shalt.err (!%p1401_p12)
}
 0x6a4   :  { %s1405_s15 = scalar_lea.hbm %s1804_s5, 512 }
 0x6a5   :  { %p1406_p13 = scmp.ne.s32.totalorder %s1804_s5, %s1405_s15  ;;  %p1409_p0 = scmp.lt.u32.totalorder %s1405_s15, %s1804_s5 }
 0x6a7   :  { %p1411_p1 = pnand %p1409_p0, %p1406_p13 }
 0x6a9   :  { %1414 = shalt.err (!%p1411_p1)
}
 0x6aa   :  { %s1426_s20 = smov 128   ;;  %s1427_s21 = smov 8  }
 0x6ab   :  { %1095 = dma.vmem_to_hbm [thread:$0]  %s1090_s12, 512, %s1804_s5, [#allocation3], %s1426_s20, %s1426_s20, %s1427_s21  }
 0x6ac   :  { %1415 = dma.done.wait [#allocation3], 512  }
 0x6ad   :  { %1416 = vsyncadd [#allocation3], 4294966784 }
 0x6ae   :  { %1417 = dma.done.wait [#allocation5], 256  }
 0x6af   :  { %1418 = vsyncadd [#allocation5], 4294967040 }
 0x6b0   :  { %1114 = vsyncpa [#allocation3], 1 }
 0x6b1   :  { %1115 = vsyncpa [#allocation5], 1 }

</bundles_post_ra>
